<compile_context>
chip_gen: v7x
topology: tpu7x:2x2x1
jax: 0.10.0
libtpu: 0.0.40
codegen_flags: <defaults>
</compile_context>

<pallas_src>
import functools

import jax
import jax.numpy as jnp
from jax.experimental import pallas as pl
from jax.experimental.pallas import tpu as pltpu


def _round_up(x: int, m: int) -> int:
    return ((x + m - 1) // m) * m


def _cdiv(a: int, b: int) -> int:
    return (a + b - 1) // b


def _tpu_generation_info():
    """Returns (vmem_capacity_bytes, dual_tensorcore) with conservative fallbacks."""
    vmem_cap = 128 << 20
    try:
        info = pltpu.get_tpu_info()
        vmem_cap = int(getattr(info, "vmem_capacity_bytes", vmem_cap))
    except Exception:
        pass
    # v7x exposes 64 MiB of VMEM per TensorCore and has 2 TCs per chip;
    # v5e/v6e expose 128 MiB and have a single TC.
    dual_tc = vmem_cap <= (64 << 20)
    return vmem_cap, dual_tc


def _choose_tile_b(B: int, *, dual_tc: bool, target: int = 512) -> int:
    """Pick a batch tile: multiple of 8, roughly `target` rows.

    Single-TC chips get one big tile (no forced grid split). Dual-TC chips
    (v7x) get an even grid so the parallel batch axis splits across both TCs.
    """
    if B <= 8:
        return 8
    if not dual_tc:
        g = max(1, _cdiv(B, target))
    else:
        g = max(2, _round_up(_cdiv(B, target), 2))
    return max(8, _round_up(_cdiv(B, g), 8))


def _mlp_kernel(*refs, n_layers: int):
    """refs = (x_ref, w0, b0, w1, b1, ..., o_ref).

    h = x; per layer: h = h @ W + b (bf16 operands, f32 accumulation on the MXU);
    ReLU (in f32) on all but the last layer. Activations never leave VMEM.
    """
    x_ref = refs[0]
    o_ref = refs[-1]
    params = refs[1:-1]

    h = x_ref[...]  # f32; cast to bf16 per layer (VPU has slack vs DMA/MXU)
    for layer in range(n_layers):
        w_ref = params[2 * layer]
        b_ref = params[2 * layer + 1]
        acc = jnp.dot(h.astype(jnp.bfloat16), w_ref[...],
                      preferred_element_type=jnp.float32)
        acc = acc + b_ref[...]  # bias is f32 (1, out), broadcasts over rows
        if layer < n_layers - 1:
            acc = jnp.maximum(acc, 0.0)  # nn.ReLU()
        h = acc
    o_ref[...] = h.astype(o_ref.dtype)


def simple_encoder_forward(x, weights, biases, *, tile_b=None):
    """Pallas forward pass of SimpleEncoder.

    x:        (B, ...) input, flattened to (B, F) like torch's batch.flatten(1)
    weights:  list of (in_dim, out_dim) f32 matrices (transposed vs PyTorch)
    biases:   list of (out_dim,) f32 vectors
    """
    orig_dtype = x.dtype
    B = x.shape[0]
    x2 = x.reshape(B, -1)  # row-major flatten == torch.flatten(1)
    in_dim = x2.shape[1]
    n_layers = len(weights)
    out_dim = weights[-1].shape[1]
    assert weights[0].shape[0] == in_dim

    vmem_cap, dual_tc = _tpu_generation_info()

    # ---- batch tiling ----
    if tile_b is None:
        tile_b = _choose_tile_b(B, dual_tc=dual_tc)
    assert tile_b % 8 == 0 and tile_b >= 8, "tile_b must be a multiple of 8"
    B_pad = _round_up(B, tile_b)
    grid = (B_pad // tile_b,)

    # ---- lane-dense final output (pad out_dim up to a multiple of 128) ----
    out_pad = max(128, _round_up(out_dim, 128))

    # ---- operand prep ----
    # x stays f32: the kernel casts to bf16 in VMEM, saving a wrapper-side
    # read/write pass over the whole input. Pad only when actually needed.
    x_p = x2 if B_pad == B else jnp.pad(x2, ((0, B_pad - B), (0, 0)))

    w_list, b_list = [], []
    for li, (w, b) in enumerate(zip(weights, biases)):
        if li == n_layers - 1 and out_pad != out_dim:
            w = jnp.pad(w, ((0, 0), (0, out_pad - out_dim)))
            b = jnp.pad(b, ((0, out_pad - out_dim),))
        w_list.append(w.astype(jnp.bfloat16))
        b_list.append(b.reshape(1, -1).astype(jnp.float32))

    # ---- BlockSpecs ----
    resident = pl.Buffered(1)  # constant-index params: no double buffering
    in_specs = [pl.BlockSpec((tile_b, in_dim), lambda i: (i, 0))]
    for w, b2 in zip(w_list, b_list):
        in_specs.append(
            pl.BlockSpec(w.shape, lambda i: (0, 0), pipeline_mode=resident))
        in_specs.append(
            pl.BlockSpec(b2.shape, lambda i: (0, 0), pipeline_mode=resident))
    out_spec = pl.BlockSpec((tile_b, out_pad), lambda i: (i, 0))

    # ---- VMEM budget (double-buffered x/out tiles, single-buffered params,
    #      plus per-layer activation temporaries), generation-aware ceiling ----
    x_bytes = jnp.dtype(x_p.dtype).itemsize
    o_bytes = jnp.dtype(orig_dtype).itemsize
    w_bytes = sum(int(w.size) for w in w_list) * 2    # bf16, single-buffered
    b_bytes = sum(int(b.size) for b in b_list) * 4    # f32, single-buffered
    max_width = max([in_dim, out_pad] + [int(w.shape[1]) for w in w_list])
    act_bytes = tile_b * max_width * (4 + 2 + 4)      # f32 acc + bf16 cast + dot out
    vmem_bytes = (
        2 * tile_b * in_dim * x_bytes                 # x tile (double-buffered)
        + w_bytes + b_bytes                           # resident params
        + 2 * tile_b * out_pad * o_bytes              # output tile (double-buffered)
        + act_bytes
    )
    if vmem_cap <= (64 << 20):                        # v7x
        ceiling = vmem_cap - (8 << 20)
    else:                                             # v5e / v6e
        ceiling = 108 << 20
    vmem_limit = int(min(ceiling, max(32 << 20, vmem_bytes * 3 // 2)))

    # ---- cost estimate for XLA scheduling around the custom call ----
    flops = 2 * B_pad * sum(int(w.shape[0]) * int(w.shape[1]) for w in w_list)
    bytes_accessed = (B_pad * in_dim * x_bytes + w_bytes + b_bytes
                      + B_pad * out_pad * o_bytes)

    kernel = functools.partial(_mlp_kernel, n_layers=n_layers)
    call = pl.pallas_call(
        kernel,
        out_shape=jax.ShapeDtypeStruct((B_pad, out_pad), orig_dtype),
        grid_spec=pltpu.PrefetchScalarGridSpec(
            num_scalar_prefetch=0,
            grid=grid,
            in_specs=in_specs,
            out_specs=out_spec,
        ),
        compiler_params=pltpu.CompilerParams(
            dimension_semantics=("parallel",),
            vmem_limit_bytes=vmem_limit,
        ),
        cost_estimate=pl.CostEstimate(
            flops=flops, transcendentals=0, bytes_accessed=bytes_accessed),
    )

    args = [x_p]
    for w, b2 in zip(w_list, b_list):
        args.append(w)
        args.append(b2)
    out = call(*args)
    return out[:B, :out_dim]


def init_simple_encoder_params(key, dimensions):
    """nn.Linear-shaped init. Weights stored transposed: (in_dim, out_dim)."""
    weights, biases = [], []
    dims = tuple(dimensions)
    for (d_in, d_out) in zip(dims, dims[1:]):
        key, kw, kb = jax.random.split(key, 3)
        bound = 1.0 / (d_in ** 0.5)
        weights.append(jax.random.uniform(kw, (d_in, d_out), jnp.float32, -bound, bound))
        biases.append(jax.random.uniform(kb, (d_out,), jnp.float32, -bound, bound))
    return weights, biases


def _reference_forward_bf16(x, weights, biases):
    """Plain-JAX reference mirroring the kernel's bf16-operand / f32-accum path."""
    h = x.reshape(x.shape[0], -1)
    n = len(weights)
    for i, (w, b) in enumerate(zip(weights, biases)):
        acc = jnp.dot(h.astype(jnp.bfloat16), w.astype(jnp.bfloat16),
                      preferred_element_type=jnp.float32) + b
        if i < n - 1:
            acc = jnp.maximum(acc, 0.0)
        h = acc
    return h


if __name__ == "__main__":
    key = jax.random.PRNGKey(0)

    # Small synthetic config: NCHW (B=2, C=4, H=16, W=16) -> flatten(1) = 1024 features.
    # SimpleEncoder(dimensions=(1024, 32, 16)) => Linear(1024,32) -> ReLU -> Linear(32,16)
    B, C, H, W = 2, 4, 16, 16
    dimensions = (C * H * W, 32, 16)

    key, kx, kp = jax.random.split(key, 3)
    x = jax.random.normal(kx, (B, C, H, W), jnp.float32)
    weights, biases = init_simple_encoder_params(kp, dimensions)

    out = simple_encoder_forward(x, weights, biases)
    out = jax.block_until_ready(out)

    ref = _reference_forward_bf16(x, weights, biases).astype(out.dtype)
    assert out.shape == (B, dimensions[-1]), out.shape
    err = float(jnp.max(jnp.abs(out - ref)))
    assert jnp.allclose(out, ref, atol=1e-2, rtol=1e-2), err

    print("KERNEL_OK")
</pallas_src>

<mosaic_0001>
module attributes {stable_mosaic.version = 11 : i64} {
  func.func @_mlp_kernel(%arg0: i32, %arg1: memref<8x1024xf32, #tpu.memory_space<vmem>>, %arg2: memref<1024x32xbf16, #tpu.memory_space<vmem>>, %arg3: memref<1x32xf32, #tpu.memory_space<vmem>>, %arg4: memref<32x128xbf16, #tpu.memory_space<vmem>>, %arg5: memref<1x128xf32, #tpu.memory_space<vmem>>, %arg6: memref<8x128xf32, #tpu.memory_space<vmem>>) attributes {dimension_semantics = [#tpu.dimension_semantics<parallel>], iteration_bounds = array<i64: 1>, scalar_prefetch = 0 : i64, scratch_operands = 0 : i64, tpu.core_type = #tpu.core_type<tc>, window_params = [{transform_indices = @transform_0, window_bounds = array<i64: 8, 1024>}, {pipeline_mode = #tpu.pipeline_mode<synchronous>, transform_indices = @transform_1, window_bounds = array<i64: 1024, 32>}, {pipeline_mode = #tpu.pipeline_mode<synchronous>, transform_indices = @transform_2, window_bounds = array<i64: 1, 32>}, {pipeline_mode = #tpu.pipeline_mode<synchronous>, transform_indices = @transform_3, window_bounds = array<i64: 32, 128>}, {pipeline_mode = #tpu.pipeline_mode<synchronous>, transform_indices = @transform_4, window_bounds = array<i64: 1, 128>}, {transform_indices = @transform_5, window_bounds = array<i64: 8, 128>}]} {
    %c0 = arith.constant 0 : index
    %c0_0 = arith.constant 0 : index
    %0 = vector.load %arg1[%c0, %c0_0] : memref<8x1024xf32, #tpu.memory_space<vmem>>, vector<8x1024xf32>
    %1 = arith.truncf %0 : vector<8x1024xf32> to vector<8x1024xbf16>
    %c0_1 = arith.constant 0 : index
    %c0_2 = arith.constant 0 : index
    %2 = vector.load %arg2[%c0_1, %c0_2] : memref<1024x32xbf16, #tpu.memory_space<vmem>>, vector<1024x32xbf16>
    %cst = arith.constant dense<0.000000e+00> : vector<8x32xf32>
    %3 = tpu.matmul %1, %2, %cst {dimension_numbers = #tpu.dot_dimension_numbers<[1], [0], [0], [1], [0, 0, 1, 1], [], []>} : vector<8x1024xbf16>, vector<1024x32xbf16>, vector<8x32xf32> -> vector<8x32xf32>
    %c0_3 = arith.constant 0 : index
    %c0_4 = arith.constant 0 : index
    %4 = vector.load %arg3[%c0_3, %c0_4] : memref<1x32xf32, #tpu.memory_space<vmem>>, vector<1x32xf32>
    %5 = vector.broadcast %4 : vector<1x32xf32> to vector<8x32xf32>
    %6 = arith.addf %3, %5 : vector<8x32xf32>
    %cst_5 = arith.constant 0.000000e+00 : f32
    %7 = vector.broadcast %cst_5 : f32 to vector<8x32xf32>
    %8 = arith.maximumf %6, %7 : vector<8x32xf32>
    %9 = arith.truncf %8 : vector<8x32xf32> to vector<8x32xbf16>
    %c0_6 = arith.constant 0 : index
    %c0_7 = arith.constant 0 : index
    %10 = vector.load %arg4[%c0_6, %c0_7] : memref<32x128xbf16, #tpu.memory_space<vmem>>, vector<32x128xbf16>
    %cst_8 = arith.constant dense<0.000000e+00> : vector<8x128xf32>
    %11 = tpu.matmul %9, %10, %cst_8 {dimension_numbers = #tpu.dot_dimension_numbers<[1], [0], [0], [1], [0, 0, 1, 1], [], []>} : vector<8x32xbf16>, vector<32x128xbf16>, vector<8x128xf32> -> vector<8x128xf32>
    %c0_9 = arith.constant 0 : index
    %c0_10 = arith.constant 0 : index
    %12 = vector.load %arg5[%c0_9, %c0_10] : memref<1x128xf32, #tpu.memory_space<vmem>>, vector<1x128xf32>
    %13 = vector.broadcast %12 : vector<1x128xf32> to vector<8x128xf32>
    %14 = arith.addf %11, %13 : vector<8x128xf32>
    %c0_11 = arith.constant 0 : index
    %c0_12 = arith.constant 0 : index
    %15 = vector.load %arg6[%c0_11, %c0_12] : memref<8x128xf32, #tpu.memory_space<vmem>>, vector<8x128xf32>
    tpu.vector_store %arg6[%c0_11, %c0_12], %14 {strides = array<i32>} : memref<8x128xf32, #tpu.memory_space<vmem>>, vector<8x128xf32>,
    return
  }
  func.func @transform_0(%arg0: i32) -> (i32, i32) {
    %c0_i32 = arith.constant 0 : i32
    %c0_i32_0 = arith.constant 0 : i32
    return %arg0, %c0_i32 : i32, i32
  }
  func.func @transform_1(%arg0: i32) -> (i32, i32) {
    %c0_i32 = arith.constant 0 : i32
    %c0_i32_0 = arith.constant 0 : i32
    %c0_i32_1 = arith.constant 0 : i32
    return %c0_i32, %c0_i32_0 : i32, i32
  }
  func.func @transform_2(%arg0: i32) -> (i32, i32) {
    %c0_i32 = arith.constant 0 : i32
    %c0_i32_0 = arith.constant 0 : i32
    %c0_i32_1 = arith.constant 0 : i32
    return %c0_i32, %c0_i32_0 : i32, i32
  }
  func.func @transform_3(%arg0: i32) -> (i32, i32) {
    %c0_i32 = arith.constant 0 : i32
    %c0_i32_0 = arith.constant 0 : i32
    %c0_i32_1 = arith.constant 0 : i32
    return %c0_i32, %c0_i32_0 : i32, i32
  }
  func.func @transform_4(%arg0: i32) -> (i32, i32) {
    %c0_i32 = arith.constant 0 : i32
    %c0_i32_0 = arith.constant 0 : i32
    %c0_i32_1 = arith.constant 0 : i32
    return %c0_i32, %c0_i32_0 : i32, i32
  }
  func.func @transform_5(%arg0: i32) -> (i32, i32) {
    %c0_i32 = arith.constant 0 : i32
    %c0_i32_0 = arith.constant 0 : i32
    return %arg0, %c0_i32 : i32, i32
  }
}

</mosaic_0001>

<bundles_post_ra>
// kernel: tpu_custom_call.1
= control target key start
LH: loop header
LB: loop body
LE: loop exit
PB: predicated region body
PF: predicated region fallthrough
CT: control target
= control target key end

     0   :  { %s1335_s0 = inlined_call_operand.vmem [shape: f32[8,1024], index: 0, kind: input, shape index: {}]   ;;  %s1336_s1 = inlined_call_operand.vmem [shape: bf16[1024,32], index: 1, kind: input, shape index: {}]   ;;  %s1337_s2 = inlined_call_operand.vmem [shape: f32[1,32], index: 2, kind: input, shape index: {}]   ;;  %s1338_s3 = inlined_call_operand.vmem [shape: bf16[32,128], index: 3, kind: input, shape index: {}]   ;;  %s1339_s4 = inlined_call_operand.vmem [shape: f32[1,128], index: 4, kind: input, shape index: {}]   ;;  %s1340_s5 = inlined_call_operand.hbm [shape: f32[8,128], index: 5, kind: output, shape index: {}]  }
   0x1   :  { %v972_v0 = vld [vmem:[%s1336_s1 + $0x40] sm:$0xff]   ;;  %v976_v4 = vld [vmem:[%s1336_s1 + $0x48] sm:$0xff]   ;;  %v980_v8 = vld [vmem:[%s1336_s1 + $0x50] sm:$0xff]  }
   0x2   :  { %v973_v1 = vld [vmem:[%s1336_s1 + $0xc0] sm:$0xff]   ;;  %870 = vmatprep.subr.bf16.mxu0 %v972_v0  ;;  %v977_v5 = vld [vmem:[%s1336_s1 + $0xc8] sm:$0xff]   ;;  %v981_v9 = vld [vmem:[%s1336_s1 + $0xd0] sm:$0xff]  }
   0x3   :  { %v974_v2 = vld [vmem:[%s1336_s1] sm:$0xff]   ;;  %892 = vmatprep.subr.bf16.mxu1 %v973_v1  ;;  %v978_v6 = vld [vmem:[%s1336_s1 + $0x8] sm:$0xff]   ;;  %v982_v10 = vld [vmem:[%s1336_s1 + $0x10] sm:$0xff]  }
   0x4   :  { %v975_v3 = vld [vmem:[%s1336_s1 + $0x80] sm:$0xff]   ;;  %871 = vmatpush3.bf16.msra.mxu0 %v974_v2  ;;  %v979_v7 = vld [vmem:[%s1336_s1 + $0x88] sm:$0xff]   ;;  %v983_v11 = vld [vmem:[%s1336_s1 + $0x90] sm:$0xff]  }
   0x5   :  { %893 = vmatpush3.bf16.msra.mxu1 %v975_v3  ;;  %872 = vmatprep.subr.bf16.mxu0 %v976_v4  ;;  %v984_v12 = vld [vmem:[%s1336_s1 + $0x58] sm:$0xff]   ;;  %v988_v16 = vld [vmem:[%s1336_s1 + $0x60] sm:$0xff]   ;;  %v992_v20 = vld [vmem:[%s1336_s1 + $0x68] sm:$0xff]  }
   0x6   :  { %894 = vmatprep.subr.bf16.mxu1 %v977_v5  ;;  %v985_v13 = vld [vmem:[%s1336_s1 + $0xd8] sm:$0xff]   ;;  %v989_v17 = vld [vmem:[%s1336_s1 + $0xe0] sm:$0xff]   ;;  %v993_v21 = vld [vmem:[%s1336_s1 + $0xe8] sm:$0xff]  }
   0x7   :  { %v986_v14 = vld [vmem:[%s1336_s1 + $0x18] sm:$0xff]   ;;  %v990_v18 = vld [vmem:[%s1336_s1 + $0x20] sm:$0xff]   ;;  %v994_v22 = vld [vmem:[%s1336_s1 + $0x28] sm:$0xff]  }
   0x8   :  { %873 = vmatpush3.bf16.msra.mxu0 %v978_v6  ;;  %v987_v15 = vld [vmem:[%s1336_s1 + $0x98] sm:$0xff]   ;;  %v991_v19 = vld [vmem:[%s1336_s1 + $0xa0] sm:$0xff]   ;;  %v995_v23 = vld [vmem:[%s1336_s1 + $0xa8] sm:$0xff]  }
   0x9   :  { %895 = vmatpush3.bf16.msra.mxu1 %v979_v7  ;;  %874 = vmatprep.subr.bf16.mxu0 %v980_v8  ;;  %v996_v24 = vld [vmem:[%s1336_s1 + $0x70] sm:$0xff]   ;;  %v1000_v28 = vld [vmem:[%s1336_s1 + $0x78] sm:$0xff]   ;;  %v23_v32 = vld [vmem:[%s1335_s0 + $0x8] sm:$0xff] }
   0xa   :  { %896 = vmatprep.subr.bf16.mxu1 %v981_v9  ;;  %v997_v25 = vld [vmem:[%s1336_s1 + $0xf0] sm:$0xff]   ;;  %v1001_v29 = vld [vmem:[%s1336_s1 + $0xf8] sm:$0xff]   ;;  %v22_v34 = vld [vmem:[%s1335_s0] sm:$0xff]  ;;  %v31_v35 = vpack.c.bf16 %v23_v32, %v23_v32 }
   0xb   :  { %v998_v26 = vld [vmem:[%s1336_s1 + $0x30] sm:$0xff]   ;;  %v1002_v30 = vld [vmem:[%s1336_s1 + $0x38] sm:$0xff]   ;;  %v30_v37 = vpack.c.bf16 %v22_v34, %v22_v34  ;;  %v1004_v40 = vld [vmem:[%s1336_s1 + $0x140] sm:$0xff]  }
   0xc   :  { %875 = vmatpush3.bf16.msra.mxu0 %v982_v10  ;;  %v999_v27 = vld [vmem:[%s1336_s1 + $0xb0] sm:$0xff]   ;;  %v1003_v31 = vld [vmem:[%s1336_s1 + $0xb8] sm:$0xff]   ;;  %589 = vmatprep.mubr.bf16.mxu0 %v31_v35  ;;  %v1005_v41 = vld [vmem:[%s1336_s1 + $0x1c0] sm:$0xff]  }
   0xd   :  { %897 = vmatpush3.bf16.msra.mxu1 %v983_v11  ;;  %876 = vmatprep.subr.bf16.mxu0 %v984_v12  ;;  %v25_v33 = vld [vmem:[%s1335_s0 + $0x18] sm:$0xff]  ;;  %v24_v38 = vld [vmem:[%s1335_s0 + $0x10] sm:$0xff]  ;;  %v1006_v42 = vld [vmem:[%s1336_s1 + $0x100] sm:$0xff]  }
   0xe   :  { %898 = vmatprep.subr.bf16.mxu1 %v985_v13  ;;  %v33_v36 = vpack.c.bf16 %v25_v33, %v25_v33  ;;  %v32_v39 = vpack.c.bf16 %v24_v38, %v24_v38  ;;  %v1007_v43 = vld [vmem:[%s1336_s1 + $0x180] sm:$0xff]   ;;  %v1008_v44 = vld [vmem:[%s1336_s1 + $0x148] sm:$0xff]   ;;  %v1012_v48 = vld [vmem:[%s1336_s1 + $0x150] sm:$0xff]  }
   0xf   :  { %v1009_v45 = vld [vmem:[%s1336_s1 + $0x1c8] sm:$0xff]   ;;  %v1013_v49 = vld [vmem:[%s1336_s1 + $0x1d0] sm:$0xff]   ;;  %v1016_v52 = vld [vmem:[%s1336_s1 + $0x158] sm:$0xff]  }
  0x10   :  { %877 = vmatpush3.bf16.msra.mxu0 %v986_v14  ;;  %629 = vmatprep.mubr.bf16.mxu1 %v33_v36  ;;  %v1010_v46 = vld [vmem:[%s1336_s1 + $0x108] sm:$0xff]   ;;  %v1014_v50 = vld [vmem:[%s1336_s1 + $0x110] sm:$0xff]   ;;  %v1017_v53 = vld [vmem:[%s1336_s1 + $0x1d8] sm:$0xff]  }
  0x11   :  { %899 = vmatpush3.bf16.msra.mxu1 %v987_v15  ;;  %878 = vmatprep.subr.bf16.mxu0 %v988_v16  ;;  %v1011_v47 = vld [vmem:[%s1336_s1 + $0x188] sm:$0xff]   ;;  %v1015_v51 = vld [vmem:[%s1336_s1 + $0x190] sm:$0xff]   ;;  %v1018_v54 = vld [vmem:[%s1336_s1 + $0x118] sm:$0xff]  }
  0x12   :  { %900 = vmatprep.subr.bf16.mxu1 %v989_v17  ;;  %v1019_v55 = vld [vmem:[%s1336_s1 + $0x198] sm:$0xff]   ;;  %v1020_v56 = vld [vmem:[%s1336_s1 + $0x160] sm:$0xff]   ;;  %v1024_v60 = vld [vmem:[%s1336_s1 + $0x168] sm:$0xff]  }
  0x13   :  { %v1021_v57 = vld [vmem:[%s1336_s1 + $0x1e0] sm:$0xff]   ;;  %v1025_v61 = vld [vmem:[%s1336_s1 + $0x1e8] sm:$0xff]   ;;  %v1028_v0 = vld [vmem:[%s1336_s1 + $0x170] sm:$0xff]  }
  0x14   :  { %879 = vmatpush3.bf16.msra.mxu0 %v990_v18  ;;  %v1022_v58 = vld [vmem:[%s1336_s1 + $0x120] sm:$0xff]   ;;  %v1026_v62 = vld [vmem:[%s1336_s1 + $0x128] sm:$0xff]   ;;  %v1029_v1 = vld [vmem:[%s1336_s1 + $0x1f0] sm:$0xff]  }
  0x15   :  { %901 = vmatpush3.bf16.msra.mxu1 %v991_v19  ;;  %880 = vmatprep.subr.bf16.mxu0 %v992_v20  ;;  %v1023_v59 = vld [vmem:[%s1336_s1 + $0x1a0] sm:$0xff]   ;;  %v1027_v63 = vld [vmem:[%s1336_s1 + $0x1a8] sm:$0xff]   ;;  %v1030_v2 = vld [vmem:[%s1336_s1 + $0x130] sm:$0xff]  }
  0x16   :  { %902 = vmatprep.subr.bf16.mxu1 %v993_v21  ;;  %v1031_v3 = vld [vmem:[%s1336_s1 + $0x1b0] sm:$0xff]   ;;  %v1032_v4 = vld [vmem:[%s1336_s1 + $0x178] sm:$0xff]   ;;  %v27_v8 = vld [vmem:[%s1335_s0 + $0x28] sm:$0xff] }
  0x17   :  { %v1033_v5 = vld [vmem:[%s1336_s1 + $0x1f8] sm:$0xff]   ;;  %v35_v10 = vpack.c.bf16 %v27_v8, %v27_v8  ;;  %v26_v12 = vld [vmem:[%s1335_s0 + $0x20] sm:$0xff]  ;;  %v28_v13 = vld [vmem:[%s1335_s0 + $0x30] sm:$0xff] }
  0x18   :  { %881 = vmatpush3.bf16.msra.mxu0 %v994_v22  ;;  %v1034_v6 = vld [vmem:[%s1336_s1 + $0x138] sm:$0xff]   ;;  %v34_v14 = vpack.c.bf16 %v26_v12, %v26_v12  ;;  %v36_v15 = vpack.c.bf16 %v28_v13, %v28_v13 }
  0x19   :  { %903 = vmatpush3.bf16.msra.mxu1 %v995_v23  ;;  %882 = vmatprep.subr.bf16.mxu0 %v996_v24  ;;  %v1035_v7 = vld [vmem:[%s1336_s1 + $0x1b8] sm:$0xff]  }
  0x1a   :  { %904 = vmatprep.subr.bf16.mxu1 %v997_v25  ;;  %v29_v9 = vld [vmem:[%s1335_s0 + $0x38] sm:$0xff] }
  0x1b   :  { %v37_v11 = vpack.c.bf16 %v29_v9, %v29_v9 }
  0x1c   :  { %883 = vmatpush3.bf16.msra.mxu0 %v998_v26 }
  0x1d   :  { %905 = vmatpush3.bf16.msra.mxu1 %v999_v27  ;;  %884 = vmatprep.subr.bf16.mxu0 %v1000_v28 }
  0x1e   :  { %906 = vmatprep.subr.bf16.mxu1 %v1001_v29 }
  0x20   :  { %885 = vmatpush3.bf16.msra.mxu0 %v1002_v30 }
  0x21   :  { %907 = vmatpush3.bf16.msra.mxu1 %v1003_v31  ;;  %914 = vmatprep.subr.bf16.mxu0 %v1004_v40 }
  0x22   :  { %936 = vmatprep.subr.bf16.mxu1 %v1005_v41 }
  0x23   :  { %590 = vmatmul.mubr.bf16.vlgmr.msra.gmra.mrb[0].mxu0 %v30_v37 }
  0x24   :  { %630 = vmatmul.mubr.bf16.vlgmr.msra.gmra.mrb[0].mxu1 %v32_v39  ;;  %915 = vmatpush3.bf16.msra.mxu0 %v1006_v42 }
  0x25   :  { %937 = vmatpush3.bf16.msra.mxu1 %v1007_v43  ;;  %916 = vmatprep.subr.bf16.mxu0 %v1008_v44 }
  0x26   :  { %938 = vmatprep.subr.bf16.mxu1 %v1009_v45  ;;  %669 = vmatprep.mubr.bf16.mxu0 %v35_v10 }
  0x27   :  { %709 = vmatprep.mubr.bf16.mxu1 %v37_v11 }
  0x28   :  { %917 = vmatpush3.bf16.msra.mxu0 %v1010_v46 }
  0x29   :  { %939 = vmatpush3.bf16.msra.mxu1 %v1011_v47  ;;  %918 = vmatprep.subr.bf16.mxu0 %v1012_v48 }
  0x2a   :  { %940 = vmatprep.subr.bf16.mxu1 %v1013_v49 }
  0x2c   :  { %919 = vmatpush3.bf16.msra.mxu0 %v1014_v50 }
  0x2d   :  { %941 = vmatpush3.bf16.msra.mxu1 %v1015_v51  ;;  %920 = vmatprep.subr.bf16.mxu0 %v1016_v52 }
  0x2e   :  { %942 = vmatprep.subr.bf16.mxu1 %v1017_v53 }
  0x30   :  { %921 = vmatpush3.bf16.msra.mxu0 %v1018_v54 }
  0x31   :  { %943 = vmatpush3.bf16.msra.mxu1 %v1019_v55  ;;  %922 = vmatprep.subr.bf16.mxu0 %v1020_v56 }
  0x32   :  { %944 = vmatprep.subr.bf16.mxu1 %v1021_v57 }
  0x34   :  { %923 = vmatpush3.bf16.msra.mxu0 %v1022_v58 }
  0x35   :  { %945 = vmatpush3.bf16.msra.mxu1 %v1023_v59  ;;  %924 = vmatprep.subr.bf16.mxu0 %v1024_v60 }
  0x36   :  { %946 = vmatprep.subr.bf16.mxu1 %v1025_v61 }
  0x38   :  { %925 = vmatpush3.bf16.msra.mxu0 %v1026_v62 }
  0x39   :  { %947 = vmatpush3.bf16.msra.mxu1 %v1027_v63  ;;  %926 = vmatprep.subr.bf16.mxu0 %v1028_v0 }
  0x3a   :  { %948 = vmatprep.subr.bf16.mxu1 %v1029_v1 }
  0x3c   :  { %927 = vmatpush3.bf16.msra.mxu0 %v1030_v2 }
  0x3d   :  { %949 = vmatpush3.bf16.msra.mxu1 %v1031_v3  ;;  %928 = vmatprep.subr.bf16.mxu0 %v1032_v4 }
  0x3e   :  { %950 = vmatprep.subr.bf16.mxu1 %v1033_v5 }
  0x40   :  { %929 = vmatpush3.bf16.msra.mxu0 %v1034_v6 }
  0x41   :  { %951 = vmatpush3.bf16.msra.mxu1 %v1035_v7 }
  0x42   :  { %10 = vsyncpa [#allocation3], 0  ;;  %v1036_v16 = vld [vmem:[%s1338_s3] sm:$0xff]   ;;  %v1062_v17 = vmov 0.0   ;;  %v1037_v18 = vld [vmem:[%s1338_s3 + $0x8] sm:$0xff]   ;;  %vm1063_vm0 = vmmov 0  }
  0x43   :  { %670 = vmatmul.mubr.bf16.vlgmr.msra.gmra.mrb[4].mxu0 %v34_v14  ;;  %961 = vmatprep.subr.bf16.mxu0 %v1062_v17  ;;  %v801_v21 = vld [vmem:[%s1337_s2] ss:$0 sm:$0xff]  ;;  %vm742_vm1 = vcmask 261120   ;;  %s1064_s16 = smov [#allocation2]  }
  0x44   :  { %710 = vmatmul.mubr.bf16.vlgmr.msra.gmra.mrb[4].mxu1 %v36_v15  ;;  %962 = vmatpush3.bf16.msra.mxu0 %v1036_v16  ;;  %v866_v46 = vld [vmem:[%s1339_s4] ss:$0 sm:$0xff]  ;;  %s793_s17 = sshll.u32 %s1064_s16, 4  ;;  %s794_s17 = int_to_ptr.vmem [resolvable:$true] %s793_s17 }
  0x45   :  { %963 = vmatprep.subr.bf16.mxu0 %v1062_v17  ;;  %965 = vmatprep.mubr.msk.bf16.mxu0 %vm1063_vm0, %v1062_v17  ;;  %s1038_s18 = scalar_lea.vmem %s794_s17, 128  ;;  %p1043_p1 = scmp.lt.s32.totalorder %s794_s17, %s794_s17 }
  0x46   :  { %p1039_p0 = scmp.ne.s32.totalorder %s794_s17, %s1038_s18  ;;  %p1044_p2 = scmp.lt.s32.totalorder %s1038_s18, %s1038_s18 }
  0x48   :  { %964 = vmatpush3.bf16.msra.mxu0 %v1037_v18  ;;  %p1045_p3 = por %p1044_p2, %p1043_p1 }
  0x4a   :  { %p1046_p4 = pnand %p1045_p3, %p1039_p0 }
  0xf6   :  { %v886_v19 = vpop.f32.mrb[0].mxu0 }
  0xf7   :  { %v908_v20 = vpop.f32.mrb[0].mxu1  ;;  %v887_v22 = vpop.f32.mrb[1].mxu0 }
  0xf8   :  { %v909_v23 = vpop.f32.mrb[1].mxu1  ;;  %v888_v24 = vadd.f32 %v887_v22, %v886_v19  ;;  %v889_v26 = vpop.f32.mrb[2].mxu0 }
  0xf9   :  { %v910_v25 = vadd.f32 %v909_v23, %v908_v20  ;;  %v911_v27 = vpop.f32.mrb[2].mxu1  ;;  %v890_v28 = vpop.f32.mrb[3].mxu0 }
  0xfa   :  { %v912_v29 = vpop.f32.mrb[3].mxu1  ;;  %v592_v30 = vadd.f32 %v888_v24, %v801_v21 }
  0xfc   :  { %v632_v31 = vadd.f32 %v910_v25, %v592_v30 }
 0x116   :  { %v930_v32 = vpop.f32.mrb[4].mxu0 }
 0x117   :  { %v952_v33 = vpop.f32.mrb[4].mxu1  ;;  %v931_v34 = vpop.f32.mrb[5].mxu0 }
 0x118   :  { %v932_v35 = vadd.f32 %v931_v34, %v930_v32  ;;  %v953_v36 = vpop.f32.mrb[5].mxu1  ;;  %v933_v37 = vpop.f32.mrb[6].mxu0 }
 0x119   :  { %v954_v38 = vadd.f32 %v953_v36, %v952_v33  ;;  %v955_v39 = vpop.f32.mrb[6].mxu1  ;;  %v934_v40 = vpop.f32.mrb[7].mxu0 }
 0x11a   :  { %v672_v41 = vadd.f32 %v932_v35, %v632_v31  ;;  %v956_v42 = vpop.f32.mrb[7].mxu1 }
 0x11c   :  { %v712_v43 = vadd.f32 %v954_v38, %v672_v41 }
 0x11e   :  { %v717_v44 = vmax.f32 %v712_v43, 0.0 }
 0x120   :  { %v718_v45 = vpack.c.bf16 %v717_v44, %v717_v44 }
 0x122   :  { %966 = vmatmul.mubr.msk.bf16.vlgmr.msra.gmra.mrb[8].mxu0 %vm742_vm1, %v718_v45 }
 0x1f5   :  { %v780_v47 = vpop.f32.mrb[8].mxu0 }
 0x1f6   :  { %v781_v48 = vadd.f32 %v866_v46, %v780_v47  ;;  %v967_v49 = vpop.f32.mrb[9].mxu0 }
 0x1f7   :  { %v783_v50 = vpop.f32.mrb[10].mxu0 }
 0x1f8   :  { %786 = vst [vmem:[#allocation2] sm:$0xff] %v781_v48  ;;  %v968_v51 = vpop.f32.mrb[11].mxu0 }
 0x1f9   :  { %1049 = shalt.err (!%p1046_p4)
}
 0x1fa   :  { %s1050_s4 = scalar_lea.hbm %s1340_s5, 128 }
 0x1fb   :  { %p1051_p5 = scmp.ne.s32.totalorder %s1340_s5, %s1050_s4  ;;  %p1054_p6 = scmp.lt.u32.totalorder %s1050_s4, %s1340_s5 }
 0x1fd   :  { %p1056_p7 = pnand %p1054_p6, %p1051_p5 }
 0x1ff   :  { %1059 = shalt.err (!%p1056_p7)
}
 0x200   :  { %796 = dma.vmem_to_hbm [thread:$0]  %s794_s17, 128, %s1340_s5, [#allocation3]  }
 0x201   :  { %1060 = dma.done.wait [#allocation3], 128  }
 0x202   :  { %1061 = vsyncadd [#allocation3], 4294967168 }
 0x203   :  { %800 = vsyncpa [#allocation3], 1 }

</bundles_post_ra>
